<compile_context>
chip_gen: v6e
topology: v6e:2x2x1
jax: 0.10.0
libtpu: 0.0.40
codegen_flags: <defaults>
</compile_context>

<pallas_src>
import numpy as np
import jax
import jax.numpy as jnp
from jax import lax
from jax.experimental import pallas as pl
from jax.experimental.pallas import tpu as pltpu

KERNEL_SIZE = 15
THRESHOLD = 0.6
ITERATIONS = 1
R = KERNEL_SIZE // 2


# ----------------------------------------------------------------------------
# Weights (compile-time constants, reproduced from the torch __init__).
# ----------------------------------------------------------------------------
def _make_soft_erosion_weight_np():
    y_idx, x_idx = np.meshgrid(
        np.arange(KERNEL_SIZE, dtype=np.float64),
        np.arange(KERNEL_SIZE, dtype=np.float64),
        indexing="ij",
    )
    dist = np.sqrt((x_idx - R) ** 2 + (y_idx - R) ** 2)
    kernel = dist.max() - dist
    kernel = kernel / kernel.sum()
    return kernel.astype(np.float32)  # (15, 15)


def make_soft_erosion_weight():
    return jnp.asarray(_make_soft_erosion_weight_np())


_T_CACHE = {}


def _banded_weight_mats(W):
    """(K, W, W) banded matrices: out_row = in_row @ T_ky realizes the kx taps
    of F.conv2d (cross-correlation) including zero 'same' padding in W."""
    if W not in _T_CACHE:
        w = _make_soft_erosion_weight_np()
        ii = np.arange(W)[:, None]
        jj = np.arange(W)[None, :]
        kx = ii - jj + R                       # tap index hit by (in col i, out col j)
        valid = (kx >= 0) & (kx < KERNEL_SIZE)
        kx_c = np.clip(kx, 0, KERNEL_SIZE - 1)
        T = np.stack(
            [np.where(valid, w[ky][kx_c], 0.0) for ky in range(KERNEL_SIZE)]
        ).astype(np.float32)
        _T_CACHE[W] = jnp.asarray(T)
    return _T_CACHE[W]


# ----------------------------------------------------------------------------
# Conv kernel: 15 banded MXU matmuls + fused per-image unmasked max.
# ----------------------------------------------------------------------------
def _pick_strip_rows(H, W):
    """Rows per output strip; keep the vreg-resident f32 accumulator ~<= 64 KiB."""
    budget = max(8, ((64 * 1024) // (4 * max(W, 128))) // 8 * 8)
    if budget >= H:
        return H
    best = None
    for d in range(8, budget + 1, 8):
        if H % d == 0:
            best = d
    return best if best is not None else H


def _make_conv_kernel(H, W, tS, fuse_min):
    n_strips = H // tS
    assert n_strips * tS == H

    def kernel(x_ref, t_ref, y_ref, bmax_ref, xp_ref):
        # x_ref:  (1, H, W) f32 input image block
        # t_ref:  (K, W, W) f32 banded weight matrices (resident across grid)
        # y_ref:  (1, H, W) f32 conv output
        # bmax_ref: (1, 1, 1) f32 per-image max of values < threshold
        # xp_ref: (H + 2R, W) f32 scratch: row-halo padded copy of the input

        # In-kernel zero row-halo (replaces the HBM-side jnp.pad of v1).
        zeros_halo = jnp.zeros((R, W), jnp.float32)
        xp_ref[0:R, :] = zeros_halo
        xp_ref[H + R:H + 2 * R, :] = zeros_halo
        xp_ref[R:R + H, :] = x_ref[0]

        def strip(s, cmax):
            row0 = s * tS
            if not isinstance(row0, int) and tS % 8 == 0:
                row0 = pl.multiple_of(row0, 8)
            # Accumulate one output row-strip in registers across the 15 ky taps.
            acc = jnp.zeros((tS, W), jnp.float32)
            for ky in range(KERNEL_SIZE):
                xs = xp_ref[pl.ds(row0 + ky, tS), :]
                acc = acc + jnp.dot(xs, t_ref[ky],
                                    preferred_element_type=jnp.float32)
            if fuse_min:
                out = jnp.minimum(acc, x_ref[0, pl.ds(row0, tS), :])
            else:
                out = acc
            y_ref[0, pl.ds(row0, tS), :] = out
            # Fused reduction: max over values strictly below the threshold.
            m = acc >= jnp.float32(THRESHOLD)
            smax = jnp.max(jnp.where(m, jnp.float32(-jnp.inf), acc))
            return jnp.maximum(cmax, smax)

        cmax0 = jnp.full((1, 1), -jnp.inf, jnp.float32)
        if n_strips <= 8:
            cmax = cmax0
            for s in range(n_strips):          # fully unrolled for small images
                cmax = strip(s, cmax)
        else:
            cmax = lax.fori_loop(0, n_strips, strip, cmax0)
        bmax_ref[0] = cmax

    return kernel


def _conv_pallas(x_bhw, t_mats, fuse_min):
    B, H, W = x_bhw.shape
    tS = _pick_strip_rows(H, W)
    kernel = _make_conv_kernel(H, W, tS, fuse_min)
    y, bmax = pl.pallas_call(
        kernel,
        out_shape=(
            jax.ShapeDtypeStruct((B, H, W), jnp.float32),
            jax.ShapeDtypeStruct((B, 1, 1), jnp.float32),
        ),
        grid=(B,),
        in_specs=[
            pl.BlockSpec((1, H, W), lambda b: (b, 0, 0)),
            pl.BlockSpec((KERNEL_SIZE, W, W), lambda b: (0, 0, 0)),  # resident
        ],
        out_specs=(
            pl.BlockSpec((1, H, W), lambda b: (b, 0, 0)),
            pl.BlockSpec((1, 1, 1), lambda b: (b, 0, 0)),
        ),
        scratch_shapes=[pltpu.VMEM((H + 2 * R, W), jnp.float32)],
        compiler_params=pltpu.CompilerParams(
            dimension_semantics=("parallel",)),
    )(x_bhw, t_mats)
    return y, bmax


# ----------------------------------------------------------------------------
# Finalize: threshold / normalize with the precomputed global unmasked max.
# ----------------------------------------------------------------------------
def _finalize_kernel(inv_ref, y_ref, out_ref, mask_ref):
    # inv_ref: (1, 1) f32 in SMEM (reciprocal of the global unmasked max)
    y = y_ref[...]
    m = y >= jnp.float32(THRESHOLD)
    out_ref[...] = jnp.where(m, jnp.float32(1.0), y * inv_ref[0, 0])
    mask_ref[...] = m.astype(jnp.int8)


def _finalize(y_bhw, inv_11):
    B, H, W = y_bhw.shape
    total = B * H * W
    # Present a lane-dense minor dim (128) to the store path when possible.
    if total % 128 == 0:
        lanes, rows = 128, total // 128
    else:
        lanes, rows = W, B * H
    y2 = y_bhw.reshape(rows, lanes)

    t_r = rows
    if rows > 1024:
        for cand in (1024, 512, 256, 128, 64, 32):
            if rows % cand == 0:
                t_r = cand
                break
    grid = (rows // t_r,)

    out2, mask2 = pl.pallas_call(
        _finalize_kernel,
        out_shape=(
            jax.ShapeDtypeStruct((rows, lanes), jnp.float32),
            jax.ShapeDtypeStruct((rows, lanes), jnp.int8),
        ),
        grid=grid,
        in_specs=[
            pl.BlockSpec(memory_space=pltpu.MemorySpace.SMEM),
            pl.BlockSpec((t_r, lanes), lambda i: (i, 0)),
        ],
        out_specs=(
            pl.BlockSpec((t_r, lanes), lambda i: (i, 0)),
            pl.BlockSpec((t_r, lanes), lambda i: (i, 0)),
        ),
        compiler_params=pltpu.CompilerParams(
            dimension_semantics=("parallel",)),
    )(inv_11, y2)
    return out2.reshape(B, H, W), mask2.reshape(B, H, W)


# ----------------------------------------------------------------------------
# Forward pass (matches SoftErosion.forward; returns (x, mask)).
# ----------------------------------------------------------------------------
def soft_erosion(x_nchw, iterations=ITERATIONS):
    N, C, H, W = x_nchw.shape
    x = x_nchw.astype(jnp.float32).reshape(N * C, H, W)
    t_mats = _banded_weight_mats(W)

    for _ in range(iterations - 1):
        x, _ = _conv_pallas(x, t_mats, fuse_min=True)   # fused torch.min(x, conv(x))
    y, bmax = _conv_pallas(x, t_mats, fuse_min=False)

    gmax = jnp.max(bmax)
    # torch's x[~mask].max() raises on an empty selection; we substitute 1.0.
    gmax = jnp.where(jnp.isfinite(gmax), gmax, jnp.float32(1.0))
    inv = jnp.reshape(jnp.float32(1.0) / gmax, (1, 1))

    y_out, mask_i8 = _finalize(y, inv)
    return (y_out.reshape(N, C, H, W),
            mask_i8.astype(jnp.bool_).reshape(N, C, H, W))


# ----------------------------------------------------------------------------
# Pure-JAX reference mirroring the PyTorch forward.
# ----------------------------------------------------------------------------
def _reference(x_nchw, weight, iterations=ITERATIONS):
    x = x_nchw.astype(jnp.float32)
    N, C, H, W = x.shape
    w = jnp.tile(weight[None, None], (C, 1, 1, 1))  # (C,1,K,K) depthwise

    def conv(z):
        return lax.conv_general_dilated(
            z, w, window_strides=(1, 1), padding=((R, R), (R, R)),
            dimension_numbers=("NCHW", "OIHW", "NCHW"), feature_group_count=C)

    for _ in range(iterations - 1):
        x = jnp.minimum(x, conv(x))
    y = conv(x)
    mask = y >= THRESHOLD
    unmasked_max = jnp.max(jnp.where(mask, -jnp.inf, y))
    y = jnp.where(mask, 1.0, y / unmasked_max)
    return y, mask


if __name__ == "__main__":
    key = jax.random.PRNGKey(0)
    # SoftErosion's grouped conv with a (1,1,K,K) buffer implies a single-channel mask.
    x = jax.random.uniform(key, (2, 1, 16, 16), dtype=jnp.float32)

    y, mask = soft_erosion(x)
    y = jax.block_until_ready(y)
    mask = jax.block_until_ready(mask)

    weight = make_soft_erosion_weight()
    y_ref, mask_ref = _reference(x, weight)
    np.testing.assert_allclose(np.asarray(y), np.asarray(y_ref), rtol=1e-5, atol=1e-5)
    np.testing.assert_array_equal(np.asarray(mask), np.asarray(mask_ref))

    print("KERNEL_OK")
</pallas_src>

<mosaic_0001>
module attributes {stable_mosaic.version = 11 : i64} {
  func.func @kernel(%arg0: i32, %arg1: memref<1x16x16xf32, #tpu.memory_space<vmem>>, %arg2: memref<15x16x16xf32, #tpu.memory_space<vmem>>, %arg3: memref<1x16x16xf32, #tpu.memory_space<vmem>>, %arg4: memref<1x1x1xf32, #tpu.memory_space<vmem>>, %arg5: memref<30x16xf32, #tpu.memory_space<vmem>>) attributes {dimension_semantics = [#tpu.dimension_semantics<parallel>], iteration_bounds = array<i64: 2>, scalar_prefetch = 0 : i64, scratch_operands = 1 : i64, tpu.core_type = #tpu.core_type<tc>, window_params = [{transform_indices = @transform_0, window_bounds = array<i64: 1, 16, 16>}, {pipeline_mode = #tpu.pipeline_mode<synchronous>, transform_indices = @transform_1, window_bounds = array<i64: 15, 16, 16>}, {transform_indices = @transform_2, window_bounds = array<i64: 1, 16, 16>}, {transform_indices = @transform_3, window_bounds = array<i64: 1, 1, 1>}]} {
    %cst = arith.constant 0.000000e+00 : f32
    %0 = vector.broadcast %cst : f32 to vector<7x16xf32>
    %c0 = arith.constant 0 : index
    %c0_0 = arith.constant 0 : index
    %1 = vector.load %arg5[%c0, %c0_0] : memref<30x16xf32, #tpu.memory_space<vmem>>, vector<7x16xf32>
    tpu.vector_store %arg5[%c0, %c0_0], %0 {strides = array<i32>} : memref<30x16xf32, #tpu.memory_space<vmem>>, vector<7x16xf32>,
    %c23 = arith.constant 23 : index
    %c0_1 = arith.constant 0 : index
    %2 = vector.load %arg5[%c23, %c0_1] : memref<30x16xf32, #tpu.memory_space<vmem>>, vector<7x16xf32>
    tpu.vector_store %arg5[%c23, %c0_1], %0 {strides = array<i32>} : memref<30x16xf32, #tpu.memory_space<vmem>>, vector<7x16xf32>,
    %c0_2 = arith.constant 0 : index
    %c0_3 = arith.constant 0 : index
    %c0_4 = arith.constant 0 : index
    %3 = vector.load %arg1[%c0_2, %c0_3, %c0_4] : memref<1x16x16xf32, #tpu.memory_space<vmem>>, vector<1x16x16xf32>
    %4 = vector.shape_cast %3 : vector<1x16x16xf32> to vector<16x16xf32>
    %c7 = arith.constant 7 : index
    %c0_5 = arith.constant 0 : index
    %5 = vector.load %arg5[%c7, %c0_5] : memref<30x16xf32, #tpu.memory_space<vmem>>, vector<16x16xf32>
    tpu.vector_store %arg5[%c7, %c0_5], %4 {strides = array<i32>} : memref<30x16xf32, #tpu.memory_space<vmem>>, vector<16x16xf32>,
    %cst_6 = arith.constant 0xFF800000 : f32
    %6 = vector.broadcast %cst_6 : f32 to vector<1x1xf32>
    %cst_7 = arith.constant 0.000000e+00 : f32
    %7 = vector.broadcast %cst_7 : f32 to vector<16x16xf32>
    %c0_8 = arith.constant 0 : index
    %c0_9 = arith.constant 0 : index
    %8 = vector.load %arg5[%c0_8, %c0_9] : memref<30x16xf32, #tpu.memory_space<vmem>>, vector<16x16xf32>
    %c0_10 = arith.constant 0 : index
    %c0_11 = arith.constant 0 : index
    %c0_12 = arith.constant 0 : index
    %9 = vector.load %arg2[%c0_10, %c0_11, %c0_12] : memref<15x16x16xf32, #tpu.memory_space<vmem>>, vector<1x16x16xf32>
    %10 = vector.shape_cast %9 : vector<1x16x16xf32> to vector<16x16xf32>
    %cst_13 = arith.constant dense<0.000000e+00> : vector<16x16xf32>
    %11 = tpu.matmul %8, %10, %cst_13 {dimension_numbers = #tpu.dot_dimension_numbers<[1], [0], [0], [1], [0, 0, 1, 1], [], []>} : vector<16x16xf32>, vector<16x16xf32>, vector<16x16xf32> -> vector<16x16xf32>
    %12 = arith.addf %7, %11 : vector<16x16xf32>
    %c1 = arith.constant 1 : index
    %c0_14 = arith.constant 0 : index
    %13 = vector.load %arg5[%c1, %c0_14] : memref<30x16xf32, #tpu.memory_space<vmem>>, vector<16x16xf32>
    %c1_15 = arith.constant 1 : index
    %c0_16 = arith.constant 0 : index
    %c0_17 = arith.constant 0 : index
    %14 = vector.load %arg2[%c1_15, %c0_16, %c0_17] : memref<15x16x16xf32, #tpu.memory_space<vmem>>, vector<1x16x16xf32>
    %15 = vector.shape_cast %14 : vector<1x16x16xf32> to vector<16x16xf32>
    %cst_18 = arith.constant dense<0.000000e+00> : vector<16x16xf32>
    %16 = tpu.matmul %13, %15, %cst_18 {dimension_numbers = #tpu.dot_dimension_numbers<[1], [0], [0], [1], [0, 0, 1, 1], [], []>} : vector<16x16xf32>, vector<16x16xf32>, vector<16x16xf32> -> vector<16x16xf32>
    %17 = arith.addf %12, %16 : vector<16x16xf32>
    %c2 = arith.constant 2 : index
    %c0_19 = arith.constant 0 : index
    %18 = vector.load %arg5[%c2, %c0_19] : memref<30x16xf32, #tpu.memory_space<vmem>>, vector<16x16xf32>
    %c2_20 = arith.constant 2 : index
    %c0_21 = arith.constant 0 : index
    %c0_22 = arith.constant 0 : index
    %19 = vector.load %arg2[%c2_20, %c0_21, %c0_22] : memref<15x16x16xf32, #tpu.memory_space<vmem>>, vector<1x16x16xf32>
    %20 = vector.shape_cast %19 : vector<1x16x16xf32> to vector<16x16xf32>
    %cst_23 = arith.constant dense<0.000000e+00> : vector<16x16xf32>
    %21 = tpu.matmul %18, %20, %cst_23 {dimension_numbers = #tpu.dot_dimension_numbers<[1], [0], [0], [1], [0, 0, 1, 1], [], []>} : vector<16x16xf32>, vector<16x16xf32>, vector<16x16xf32> -> vector<16x16xf32>
    %22 = arith.addf %17, %21 : vector<16x16xf32>
    %c3 = arith.constant 3 : index
    %c0_24 = arith.constant 0 : index
    %23 = vector.load %arg5[%c3, %c0_24] : memref<30x16xf32, #tpu.memory_space<vmem>>, vector<16x16xf32>
    %c3_25 = arith.constant 3 : index
    %c0_26 = arith.constant 0 : index
    %c0_27 = arith.constant 0 : index
    %24 = vector.load %arg2[%c3_25, %c0_26, %c0_27] : memref<15x16x16xf32, #tpu.memory_space<vmem>>, vector<1x16x16xf32>
    %25 = vector.shape_cast %24 : vector<1x16x16xf32> to vector<16x16xf32>
    %cst_28 = arith.constant dense<0.000000e+00> : vector<16x16xf32>
    %26 = tpu.matmul %23, %25, %cst_28 {dimension_numbers = #tpu.dot_dimension_numbers<[1], [0], [0], [1], [0, 0, 1, 1], [], []>} : vector<16x16xf32>, vector<16x16xf32>, vector<16x16xf32> -> vector<16x16xf32>
    %27 = arith.addf %22, %26 : vector<16x16xf32>
    %c4 = arith.constant 4 : index
    %c0_29 = arith.constant 0 : index
    %28 = vector.load %arg5[%c4, %c0_29] : memref<30x16xf32, #tpu.memory_space<vmem>>, vector<16x16xf32>
    %c4_30 = arith.constant 4 : index
    %c0_31 = arith.constant 0 : index
    %c0_32 = arith.constant 0 : index
    %29 = vector.load %arg2[%c4_30, %c0_31, %c0_32] : memref<15x16x16xf32, #tpu.memory_space<vmem>>, vector<1x16x16xf32>
    %30 = vector.shape_cast %29 : vector<1x16x16xf32> to vector<16x16xf32>
    %cst_33 = arith.constant dense<0.000000e+00> : vector<16x16xf32>
    %31 = tpu.matmul %28, %30, %cst_33 {dimension_numbers = #tpu.dot_dimension_numbers<[1], [0], [0], [1], [0, 0, 1, 1], [], []>} : vector<16x16xf32>, vector<16x16xf32>, vector<16x16xf32> -> vector<16x16xf32>
    %32 = arith.addf %27, %31 : vector<16x16xf32>
    %c5 = arith.constant 5 : index
    %c0_34 = arith.constant 0 : index
    %33 = vector.load %arg5[%c5, %c0_34] : memref<30x16xf32, #tpu.memory_space<vmem>>, vector<16x16xf32>
    %c5_35 = arith.constant 5 : index
    %c0_36 = arith.constant 0 : index
    %c0_37 = arith.constant 0 : index
    %34 = vector.load %arg2[%c5_35, %c0_36, %c0_37] : memref<15x16x16xf32, #tpu.memory_space<vmem>>, vector<1x16x16xf32>
    %35 = vector.shape_cast %34 : vector<1x16x16xf32> to vector<16x16xf32>
    %cst_38 = arith.constant dense<0.000000e+00> : vector<16x16xf32>
    %36 = tpu.matmul %33, %35, %cst_38 {dimension_numbers = #tpu.dot_dimension_numbers<[1], [0], [0], [1], [0, 0, 1, 1], [], []>} : vector<16x16xf32>, vector<16x16xf32>, vector<16x16xf32> -> vector<16x16xf32>
    %37 = arith.addf %32, %36 : vector<16x16xf32>
    %c6 = arith.constant 6 : index
    %c0_39 = arith.constant 0 : index
    %38 = vector.load %arg5[%c6, %c0_39] : memref<30x16xf32, #tpu.memory_space<vmem>>, vector<16x16xf32>
    %c6_40 = arith.constant 6 : index
    %c0_41 = arith.constant 0 : index
    %c0_42 = arith.constant 0 : index
    %39 = vector.load %arg2[%c6_40, %c0_41, %c0_42] : memref<15x16x16xf32, #tpu.memory_space<vmem>>, vector<1x16x16xf32>
    %40 = vector.shape_cast %39 : vector<1x16x16xf32> to vector<16x16xf32>
    %cst_43 = arith.constant dense<0.000000e+00> : vector<16x16xf32>
    %41 = tpu.matmul %38, %40, %cst_43 {dimension_numbers = #tpu.dot_dimension_numbers<[1], [0], [0], [1], [0, 0, 1, 1], [], []>} : vector<16x16xf32>, vector<16x16xf32>, vector<16x16xf32> -> vector<16x16xf32>
    %42 = arith.addf %37, %41 : vector<16x16xf32>
    %c7_44 = arith.constant 7 : index
    %c0_45 = arith.constant 0 : index
    %43 = vector.load %arg5[%c7_44, %c0_45] : memref<30x16xf32, #tpu.memory_space<vmem>>, vector<16x16xf32>
    %c7_46 = arith.constant 7 : index
    %c0_47 = arith.constant 0 : index
    %c0_48 = arith.constant 0 : index
    %44 = vector.load %arg2[%c7_46, %c0_47, %c0_48] : memref<15x16x16xf32, #tpu.memory_space<vmem>>, vector<1x16x16xf32>
    %45 = vector.shape_cast %44 : vector<1x16x16xf32> to vector<16x16xf32>
    %cst_49 = arith.constant dense<0.000000e+00> : vector<16x16xf32>
    %46 = tpu.matmul %43, %45, %cst_49 {dimension_numbers = #tpu.dot_dimension_numbers<[1], [0], [0], [1], [0, 0, 1, 1], [], []>} : vector<16x16xf32>, vector<16x16xf32>, vector<16x16xf32> -> vector<16x16xf32>
    %47 = arith.addf %42, %46 : vector<16x16xf32>
    %c8 = arith.constant 8 : index
    %c0_50 = arith.constant 0 : index
    %48 = vector.load %arg5[%c8, %c0_50] : memref<30x16xf32, #tpu.memory_space<vmem>>, vector<16x16xf32>
    %c8_51 = arith.constant 8 : index
    %c0_52 = arith.constant 0 : index
    %c0_53 = arith.constant 0 : index
    %49 = vector.load %arg2[%c8_51, %c0_52, %c0_53] : memref<15x16x16xf32, #tpu.memory_space<vmem>>, vector<1x16x16xf32>
    %50 = vector.shape_cast %49 : vector<1x16x16xf32> to vector<16x16xf32>
    %cst_54 = arith.constant dense<0.000000e+00> : vector<16x16xf32>
    %51 = tpu.matmul %48, %50, %cst_54 {dimension_numbers = #tpu.dot_dimension_numbers<[1], [0], [0], [1], [0, 0, 1, 1], [], []>} : vector<16x16xf32>, vector<16x16xf32>, vector<16x16xf32> -> vector<16x16xf32>
    %52 = arith.addf %47, %51 : vector<16x16xf32>
    %c9 = arith.constant 9 : index
    %c0_55 = arith.constant 0 : index
    %53 = vector.load %arg5[%c9, %c0_55] : memref<30x16xf32, #tpu.memory_space<vmem>>, vector<16x16xf32>
    %c9_56 = arith.constant 9 : index
    %c0_57 = arith.constant 0 : index
    %c0_58 = arith.constant 0 : index
    %54 = vector.load %arg2[%c9_56, %c0_57, %c0_58] : memref<15x16x16xf32, #tpu.memory_space<vmem>>, vector<1x16x16xf32>
    %55 = vector.shape_cast %54 : vector<1x16x16xf32> to vector<16x16xf32>
    %cst_59 = arith.constant dense<0.000000e+00> : vector<16x16xf32>
    %56 = tpu.matmul %53, %55, %cst_59 {dimension_numbers = #tpu.dot_dimension_numbers<[1], [0], [0], [1], [0, 0, 1, 1], [], []>} : vector<16x16xf32>, vector<16x16xf32>, vector<16x16xf32> -> vector<16x16xf32>
    %57 = arith.addf %52, %56 : vector<16x16xf32>
    %c10 = arith.constant 10 : index
    %c0_60 = arith.constant 0 : index
    %58 = vector.load %arg5[%c10, %c0_60] : memref<30x16xf32, #tpu.memory_space<vmem>>, vector<16x16xf32>
    %c10_61 = arith.constant 10 : index
    %c0_62 = arith.constant 0 : index
    %c0_63 = arith.constant 0 : index
    %59 = vector.load %arg2[%c10_61, %c0_62, %c0_63] : memref<15x16x16xf32, #tpu.memory_space<vmem>>, vector<1x16x16xf32>
    %60 = vector.shape_cast %59 : vector<1x16x16xf32> to vector<16x16xf32>
    %cst_64 = arith.constant dense<0.000000e+00> : vector<16x16xf32>
    %61 = tpu.matmul %58, %60, %cst_64 {dimension_numbers = #tpu.dot_dimension_numbers<[1], [0], [0], [1], [0, 0, 1, 1], [], []>} : vector<16x16xf32>, vector<16x16xf32>, vector<16x16xf32> -> vector<16x16xf32>
    %62 = arith.addf %57, %61 : vector<16x16xf32>
    %c11 = arith.constant 11 : index
    %c0_65 = arith.constant 0 : index
    %63 = vector.load %arg5[%c11, %c0_65] : memref<30x16xf32, #tpu.memory_space<vmem>>, vector<16x16xf32>
    %c11_66 = arith.constant 11 : index
    %c0_67 = arith.constant 0 : index
    %c0_68 = arith.constant 0 : index
    %64 = vector.load %arg2[%c11_66, %c0_67, %c0_68] : memref<15x16x16xf32, #tpu.memory_space<vmem>>, vector<1x16x16xf32>
    %65 = vector.shape_cast %64 : vector<1x16x16xf32> to vector<16x16xf32>
    %cst_69 = arith.constant dense<0.000000e+00> : vector<16x16xf32>
    %66 = tpu.matmul %63, %65, %cst_69 {dimension_numbers = #tpu.dot_dimension_numbers<[1], [0], [0], [1], [0, 0, 1, 1], [], []>} : vector<16x16xf32>, vector<16x16xf32>, vector<16x16xf32> -> vector<16x16xf32>
    %67 = arith.addf %62, %66 : vector<16x16xf32>
    %c12 = arith.constant 12 : index
    %c0_70 = arith.constant 0 : index
    %68 = vector.load %arg5[%c12, %c0_70] : memref<30x16xf32, #tpu.memory_space<vmem>>, vector<16x16xf32>
    %c12_71 = arith.constant 12 : index
    %c0_72 = arith.constant 0 : index
    %c0_73 = arith.constant 0 : index
    %69 = vector.load %arg2[%c12_71, %c0_72, %c0_73] : memref<15x16x16xf32, #tpu.memory_space<vmem>>, vector<1x16x16xf32>
    %70 = vector.shape_cast %69 : vector<1x16x16xf32> to vector<16x16xf32>
    %cst_74 = arith.constant dense<0.000000e+00> : vector<16x16xf32>
    %71 = tpu.matmul %68, %70, %cst_74 {dimension_numbers = #tpu.dot_dimension_numbers<[1], [0], [0], [1], [0, 0, 1, 1], [], []>} : vector<16x16xf32>, vector<16x16xf32>, vector<16x16xf32> -> vector<16x16xf32>
    %72 = arith.addf %67, %71 : vector<16x16xf32>
    %c13 = arith.constant 13 : index
    %c0_75 = arith.constant 0 : index
    %73 = vector.load %arg5[%c13, %c0_75] : memref<30x16xf32, #tpu.memory_space<vmem>>, vector<16x16xf32>
    %c13_76 = arith.constant 13 : index
    %c0_77 = arith.constant 0 : index
    %c0_78 = arith.constant 0 : index
    %74 = vector.load %arg2[%c13_76, %c0_77, %c0_78] : memref<15x16x16xf32, #tpu.memory_space<vmem>>, vector<1x16x16xf32>
    %75 = vector.shape_cast %74 : vector<1x16x16xf32> to vector<16x16xf32>
    %cst_79 = arith.constant dense<0.000000e+00> : vector<16x16xf32>
    %76 = tpu.matmul %73, %75, %cst_79 {dimension_numbers = #tpu.dot_dimension_numbers<[1], [0], [0], [1], [0, 0, 1, 1], [], []>} : vector<16x16xf32>, vector<16x16xf32>, vector<16x16xf32> -> vector<16x16xf32>
    %77 = arith.addf %72, %76 : vector<16x16xf32>
    %c14 = arith.constant 14 : index
    %c0_80 = arith.constant 0 : index
    %78 = vector.load %arg5[%c14, %c0_80] : memref<30x16xf32, #tpu.memory_space<vmem>>, vector<16x16xf32>
    %c14_81 = arith.constant 14 : index
    %c0_82 = arith.constant 0 : index
    %c0_83 = arith.constant 0 : index
    %79 = vector.load %arg2[%c14_81, %c0_82, %c0_83] : memref<15x16x16xf32, #tpu.memory_space<vmem>>, vector<1x16x16xf32>
    %80 = vector.shape_cast %79 : vector<1x16x16xf32> to vector<16x16xf32>
    %cst_84 = arith.constant dense<0.000000e+00> : vector<16x16xf32>
    %81 = tpu.matmul %78, %80, %cst_84 {dimension_numbers = #tpu.dot_dimension_numbers<[1], [0], [0], [1], [0, 0, 1, 1], [], []>} : vector<16x16xf32>, vector<16x16xf32>, vector<16x16xf32> -> vector<16x16xf32>
    %82 = arith.addf %77, %81 : vector<16x16xf32>
    %c0_85 = arith.constant 0 : index
    %c0_86 = arith.constant 0 : index
    %c0_87 = arith.constant 0 : index
    %83 = vector.load %arg3[%c0_85, %c0_86, %c0_87] : memref<1x16x16xf32, #tpu.memory_space<vmem>>, vector<1x16x16xf32>
    %84 = vector.shape_cast %83 : vector<1x16x16xf32> to vector<16x16xf32>
    %85 = vector.shape_cast %82 : vector<16x16xf32> to vector<1x16x16xf32>
    tpu.vector_store %arg3[%c0_85, %c0_86, %c0_87], %85 {strides = array<i32>} : memref<1x16x16xf32, #tpu.memory_space<vmem>>, vector<1x16x16xf32>,
    %cst_88 = arith.constant 6.000000e-01 : f32
    %86 = vector.broadcast %cst_88 : f32 to vector<16x16xf32>
    %87 = arith.cmpf oge, %82, %86 : vector<16x16xf32>
    %cst_89 = arith.constant 0xFF800000 : f32
    %88 = vector.broadcast %cst_89 : f32 to vector<16x16xf32>
    %89 = arith.select %87, %88, %82 : vector<16x16xi1>, vector<16x16xf32>
    %90 = vector.shape_cast %89 : vector<16x16xf32> to vector<1x16x16xf32>
    %cst_90 = arith.constant dense<0xFF800000> : vector<1xf32>
    %91 = vector.multi_reduction <maximumf>, %90, %cst_90 [1, 2] : vector<1x16x16xf32> to vector<1xf32>
    %92 = vector.shape_cast %91 : vector<1xf32> to vector<1x1x1xf32>
    %93 = vector.extract %92[0, 0, 0] : f32 from vector<1x1x1xf32>
    %94 = vector.broadcast %93 : f32 to vector<1x1xf32>
    %95 = arith.maximumf %6, %94 : vector<1x1xf32>
    %c0_91 = arith.constant 0 : index
    %c0_92 = arith.constant 0 : index
    %c0_93 = arith.constant 0 : index
    %96 = vector.load %arg4[%c0_91, %c0_92, %c0_93] : memref<1x1x1xf32, #tpu.memory_space<vmem>>, vector<1x1x1xf32>
    %97 = vector.shape_cast %96 : vector<1x1x1xf32> to vector<1x1xf32>
    %98 = vector.shape_cast %95 : vector<1x1xf32> to vector<1x1x1xf32>
    tpu.vector_store %arg4[%c0_91, %c0_92, %c0_93], %98 {strides = array<i32>} : memref<1x1x1xf32, #tpu.memory_space<vmem>>, vector<1x1x1xf32>,
    return
  }
  func.func @transform_0(%arg0: i32) -> (i32, i32, i32) {
    %c0_i32 = arith.constant 0 : i32
    %c0_i32_0 = arith.constant 0 : i32
    %c0_i32_1 = arith.constant 0 : i32
    return %arg0, %c0_i32, %c0_i32_0 : i32, i32, i32
  }
  func.func @transform_1(%arg0: i32) -> (i32, i32, i32) {
    %c0_i32 = arith.constant 0 : i32
    %c0_i32_0 = arith.constant 0 : i32
    %c0_i32_1 = arith.constant 0 : i32
    %c0_i32_2 = arith.constant 0 : i32
    return %c0_i32, %c0_i32_0, %c0_i32_1 : i32, i32, i32
  }
  func.func @transform_2(%arg0: i32) -> (i32, i32, i32) {
    %c0_i32 = arith.constant 0 : i32
    %c0_i32_0 = arith.constant 0 : i32
    %c0_i32_1 = arith.constant 0 : i32
    return %arg0, %c0_i32, %c0_i32_0 : i32, i32, i32
  }
  func.func @transform_3(%arg0: i32) -> (i32, i32, i32) {
    %c0_i32 = arith.constant 0 : i32
    %c0_i32_0 = arith.constant 0 : i32
    %c0_i32_1 = arith.constant 0 : i32
    return %arg0, %c0_i32, %c0_i32_0 : i32, i32, i32
  }
}

</mosaic_0001>

<bundles_post_ra>
// kernel: tpu_custom_call.1
= control target key start
LH: loop header
LB: loop body
LE: loop exit
PB: predicated region body
PF: predicated region fallthrough
CT: control target
= control target key end

     0   :  { %9 = vsyncpa [#allocation4], 0  ;;  %s2364_s0 = inlined_call_operand.hbm [shape: f32[2,16,16], index: 0, kind: input, shape index: {}]   ;;  %s2365_s1 = inlined_call_operand.hbm [shape: f32[15,16,16], index: 1, kind: input, shape index: {}]   ;;  %s2366_s2 = inlined_call_operand.hbm [shape: f32[2,16,16], index: 2, kind: output, shape index: {0}]   ;;  %s2367_s3 = inlined_call_operand.vmem [shape: f32[2,1,1], index: 3, kind: output, shape index: {1}]  }
   0x1   :  { %11 = vsyncpa [#allocation4 + $0x1], 0 }
   0x2   :  { %12 = vsyncpa [#allocation7], 0 }
   0x3   :  { %13 = vsyncpa [#allocation5], 0 }
   0x4   :  { %15 = vsyncpa [#allocation5 + $0x1], 0  ;;  %s2108_s12 = smov 0   ;;  %s2110_s13 = smov 0  }
   0x5   :  { %s2112_s14 = smov 0   ;;  %s2114_s15 = smov 0  }
   0x6 LB: > { %s2129_s16 = sadd.s32 4294967295, %s2078_s15   ;;  %s1679_s17 = sadd.s32 4294967294, %s2078_s15   ;;  %s2078_s15 = sphi %s2114_s15, %s2389_s15   ;;  %s2074_s14 = sphi %s2112_s14, %s2388_s14   ;;  %s2070_s13 = sphi %s2110_s13, %s2387_s13   ;;  %s2066_s12 = sphi %s2108_s12, %s2386_s12  }
   0x7   : > { %p41_p0 = scmp.ne.s32.totalorder %s2070_s13, %s2066_s12  ;;  %p2368_p1 = scmp.eq.s32.totalorder %s2129_s16, 0 }
   0x8   : > { %p92_p3 = scmp.eq.s32.totalorder %s1679_s17, 1  ;;  %p1680_p5 = scmp.ge.s32.totalorder %s2078_s15, 1 }
   0x9   : > { %p2138_p4 = por %p2368_p1, %p41_p0  ;;  %p125_p7 = scmp.lt.s32.totalorder %s2078_s15, 3 }
   0xa   : > { %p2143_p6 = por %p92_p3, %p41_p0  ;;  %s2080_s21 = smov [#allocation6]  }
   0xb   : > { %s2372_s18 = scalar_select %p2138_p4, 1, 0 }
   0xc   : > { %s2373_s19 = scalar_select %p2143_p6, 1, 0 }
   0xd   : > { %p2148_p8 = pnand %p1680_p5, %p125_p7  ;;  %s137_s22 = sshll.u32 %s2080_s21, 4  ;;  %s138_s22 = int_to_ptr.vmem [resolvable:$true] %s137_s22 }
   0xe   : > { %s2162_s24 = sadd.s32 1, %s2078_s15   ;;  %s28_s25 = sadd.s32 1, %s2074_s14 }
   0xf   : > { %s2374_s20 = scalar_select %p2148_p8, 1, 0 }
  0x10   : > { %p1902_p9 = pneg %p2148_p8  ;;  %s25_s26 = ssub.s32 %s2078_s15, %s2162_s24 }
  0x11   : > { %s1967_s27 = scalar_lea.vmem %s138_s22, 3840  ;;  %p1975_p5 = scmp.lt.s32.totalorder %s138_s22, %s138_s22 }
  0x12   : > { %p2157_p11 = pnand %p1902_p9, %p2368_p1  ;;  %p1968_p13 = scmp.ne.s32.totalorder %s138_s22, %s1967_s27 }
  0x13   : > { %p1976_p7 = scmp.lt.s32.totalorder %s1967_s27, %s1967_s27 }
  0x14   : > { %p1958_p12 = pneg %p2157_p11 }
  0x15   : > { %p1977_p10 = por %p1976_p7, %p1975_p5 }
  0x16   : > { %p1970_p0 = pnand %p1968_p13, %p1958_p12 }
  0x18   : > { %p1971_p3 = pneg %p1970_p0 }
  0x1a   : > { %p1978_p2 = pnand %p1977_p10, %p1971_p3 }
  0x1c   : > { %1981 = shalt.err (!%p1978_p2)
}
  0x1d   : > { %s2081_s28 = smov 128   ;;  %s2082_s29 = smov 8  }
  0x1e   : > { %1905 = dma.hbm_to_vmem [thread:$0]  (!%p2157_p11), %s2365_s1, 3840, %s138_s22, [#allocation7], %s2081_s28, %s2081_s28, %s2082_s29  }
  0x1f   : > { %p26_p2 = scmp.eq.s32.totalorder %s25_s26, 0  ;;  %p35_p9 = scmp.ne.s32.totalorder %s2074_s14, %s2070_s13 }
  0x20   : > { %p36_p10 = scmp.eq.s32.totalorder %s2078_s15, 0  ;;  %p1915_p12 = scmp.lt.s32.totalorder %s2078_s15, 2 }
  0x21   : > { %s2182_s5 = scalar_select %p26_p2, %s2074_s14, %s28_s25  }
  0x22   : > { %p37_p13 = por %p36_p10, %p35_p9  ;;  %p2376_p0 = scmp.eq.s32.totalorder %s2129_s16, 1 }
  0x23   : > { %s151_s7 = sand.u32 1, %s2074_s14   ;;  %s1725_s8 = sshll.u32 %s2078_s15, 8 }
  0x24   : > { %p2186_p3 = por %p2376_p0, %p35_p9  ;;  %s1683_s9 = sshll.u32 %s151_s7, 4 }
  0x25   : > { %s2195_s17 = scalar_lea.hbm %s2364_s0, %s1725_s8  ;;  %s155_s21 = scalar_lea.vmem [#allocation3], %s1683_s9 }
  0x26   : > { %s2377_s6 = scalar_select %p2186_p3, 1, 0 }
  0x27   : > { %s162_s22 = sshll.u32 %s155_s21, 4  ;;  %p2197_p11 = pnand %p1915_p12, %p37_p13  ;;  %s2201_s22 = int_to_ptr.vmem [resolvable:$true] %s162_s22 }
  0x28   : > { %s2203_s25 = scalar_lea.sflag [#allocation4], %s151_s7  ;;  %s1982_s26 = scalar_lea.hbm %s2195_s17, 256 }
  0x29   : > { %p1983_p5 = scmp.ne.s32.totalorder %s2195_s17, %s1982_s26  ;;  %p1984_p7 = pneg %p2197_p11 }
  0x2a   : > { %s1987_s4 = scalar_lea.hbm %s2364_s0, 512  ;;  %p1988_p10 = scmp.lt.s32.totalorder %s2195_s17, %s2364_s0 }
  0x2b   : > { %p1985_p2 = pnand %p1984_p7, %p1983_p5  ;;  %p1989_p12 = scmp.lt.s32.totalorder %s1987_s4, %s1982_s26 }
  0x2d   : > { %p1986_p9 = pneg %p1985_p2  ;;  %p1990_p13 = por %p1989_p12, %p1988_p10 }
  0x2f   : > { %p1991_p0 = pnand %p1990_p13, %p1986_p9 }
  0x31   : > { %1994 = shalt.err (!%p1991_p0)
}
  0x32   : > { %s1995_s7 = scalar_lea.vmem %s2201_s22, 256  ;;  %s2083_s10 = smov [#allocation3]  }
  0x33   : > { %p1996_p1 = scmp.ne.s32.totalorder %s2201_s22, %s1995_s7  ;;  %s2000_s11 = sshll.u32 %s2083_s10, 4  ;;  %s2001_s11 = int_to_ptr.vmem [resolvable:$false] %s2000_s11 }
  0x34   : > { %s2002_s21 = scalar_lea.vmem %s2001_s11, 512  ;;  %p2003_p2 = scmp.lt.s32.totalorder %s2201_s22, %s2001_s11 }
  0x35   : > { %p1998_p6 = pnand %p1996_p1, %p1984_p7  ;;  %p2004_p3 = scmp.lt.s32.totalorder %s2002_s21, %s1995_s7 }
  0x37   : > { %p1999_p5 = pneg %p1998_p6  ;;  %p2005_p4 = por %p2004_p3, %p2003_p2 }
  0x39   : > { %p2006_p8 = pnand %p2005_p4, %p1999_p5 }
  0x3b   : > { %2009 = shalt.err (!%p2006_p8)
}
  0x3c   : > { %1909 = dma.hbm_to_vmem [thread:$0]  (!%p2197_p11), %s2195_s17, 256, %s2201_s22, %s2203_s25, %s2081_s28, %s2081_s28, %s2082_s29  }
  0x3d   : > { %p2379_p1 = scmp.ne.s32.totalorder %s2374_s20, 0 }
  0x3e   : > { %s2230_s26 = sand.u32 (!%p2379_p1), 1, %s2070_s13   ;;  %p2380_p4 = scmp.ne.s32.totalorder (!%p2379_p1), %s2372_s18, 0 }
  0x3f   : > { %174 = sbr.rel (%p2379_p1) target bundleno = 528 (0x210), region = 28  ;;  %s1687_s27 = sshll.u32 (!%p2379_p1), %s2230_s26, 4 }
  0x40   : > { %s177_s30 = scalar_lea.sflag (!%p2379_p1), [#allocation4], %s2230_s26  ;;  %s180_s23 = scalar_lea.vmem (!%p2379_p1), [#allocation3], %s1687_s27 }
  0x44   : > { %2053 = dma.done.wait (%p2380_p4), %s177_s30, 256  }
  0x45   : > { %2055 = vsyncadd (%p2380_p4), %s177_s30, 4294967040  ;;  %p2381_p6 = scmp.eq.s32.totalorder %s2129_s16, 0 }
  0x47   : > { %2057 = dma.done.wait (%p2381_p6), [#allocation7], 3840   ;;  %p2382_p8 = pmov %p2381_p6 }
  0x48   : > { %vm213_vm0 = vcmask 129024   ;;  %v2084_v0 = vmov 0.0   ;;  %vm218_vm1 = vcmask 130048   ;;  %v229_v1 = vld [vmem:[#allocation6 + $0x18] sm:$0xff]  ;;  %v224_v2 = vld [vmem:[#allocation6 + $0x8] sm:$0xff]  ;;  %v228_v3 = vld [vmem:[#allocation6 + $0x10] sm:$0xff] }
  0x49   : > { %2059 = vsyncadd (%p2382_p8), [#allocation7], 4294963456  ;;  %214 = vst.msk [vmem:[#allocation2] sm:$0x7f] %vm213_vm0, %v2084_v0  ;;  %1787 = vmatprep.subr.mxu0 %v229_v1  ;;  %1794 = vmatprep.subr.mxu1 %v224_v2  ;;  %v223_v4 = vld [vmem:[#allocation6] sm:$0xff]  ;;  %v396_v6 = vld [vmem:[#allocation6 + $0x28] sm:$0xff] }
  0x4a   : > { %215 = vst.msk [vmem:[#allocation2 + $0x17] sm:$0x7f] %vm213_vm0, %v2084_v0  ;;  %v216_v5 = vld [vmem:[%s180_s23] sm:$0xff]  ;;  %1788 = vmatpush3.msra.mxu0 %v229_v1  ;;  %1795 = vmatpush3.msra.mxu1 %v224_v2  ;;  %v217_v7 = vld [vmem:[%s180_s23 + $0x8] sm:$0xff]  ;;  %s204_s18 = scalar_lea.vmem [#allocation8], %s1687_s27  ;;  %s1726_s28 = sshll.u32 %s2129_s16, 8 }
  0x4b   : > { %219 = vst.msk [vmem:[#allocation2 + $0x7] sm:$0xff] %vm218_vm1, %v216_v5  ;;  %v484_v8 = vld [vmem:[#allocation6 + $0x38] sm:$0xff]  ;;  %1789 = vmatprep.subr.mxu0 %v228_v3  ;;  %1796 = vmatprep.subr.mxu1 %v223_v4  ;;  %220 = vst.msk [vmem:[#allocation2 + $0xf] sm:$0xff] %vm218_vm1, %v217_v7  ;;  %v395_v11 = vld [vmem:[#allocation6 + $0x20] sm:$0xff]  ;;  %s1574_s20 = sshll.u32 %s204_s18, 4  ;;  %s2316_s22 = scalar_lea.hbm %s2366_s2, %s1726_s28  ;;  %s2310_s20 = int_to_ptr.vmem [resolvable:$true] %s1574_s20 }
  0x4c   : > { %1790 = vmatpush3.msra.mxu0 %v228_v3  ;;  %1797 = vmatpush3.msra.mxu1 %v223_v4  ;;  %v483_v14 = vld [vmem:[#allocation6 + $0x30] sm:$0xff]  ;;  %v572_v17 = vld [vmem:[#allocation6 + $0x48] sm:$0xff]  ;;  %v660_v20 = vld [vmem:[#allocation6 + $0x58] sm:$0xff]  ;;  %s1558_s25 = scalar_lea.sflag [#allocation5], %s2230_s26  ;;  %s2010_s4 = scalar_lea.vmem %s2310_s20, 256 }
  0x4d   : > { %1801 = vmatprep.subr.mxu0 %v396_v6  ;;  %1808 = vmatprep.subr.mxu1 %v484_v8  ;;  %v571_v21 = vld [vmem:[#allocation6 + $0x40] sm:$0xff]  ;;  %v659_v22 = vld [vmem:[#allocation6 + $0x50] sm:$0xff]  ;;  %v748_v25 = vld [vmem:[#allocation6 + $0x68] sm:$0xff]  ;;  %p2011_p3 = scmp.ne.s32.totalorder %s2310_s20, %s2010_s4  ;;  %p2383_p11 = scmp.ne.s32.totalorder %s2377_s6, 0 }
  0x4e   : > { %v836_v28 = vld [vmem:[#allocation6 + $0x78] sm:$0xff]  ;;  %v747_v29 = vld [vmem:[#allocation6 + $0x60] sm:$0xff]  ;;  %v835_v30 = vld [vmem:[#allocation6 + $0x70] sm:$0xff]  ;;  %s2085_s8 = smov [#allocation8]  }
  0x4f   : > { %v924_v33 = vld [vmem:[#allocation6 + $0x88] sm:$0xff]  ;;  %v1012_v36 = vld [vmem:[#allocation6 + $0x98] sm:$0xff]  ;;  %v923_v37 = vld [vmem:[#allocation6 + $0x80] sm:$0xff]  ;;  %p2012_p7 = pnand %p2011_p3, %p2383_p11  ;;  %s2014_s9 = sshll.u32 %s2085_s8, 4  ;;  %s2015_s9 = int_to_ptr.vmem [resolvable:$false] %s2014_s9 }
  0x50   : > { %v1011_v38 = vld [vmem:[#allocation6 + $0x90] sm:$0xff]  ;;  %v1100_v39 = vld [vmem:[#allocation6 + $0xa8] sm:$0xff]  ;;  %v1188_v42 = vld [vmem:[#allocation6 + $0xb8] sm:$0xff]  ;;  %s2016_s7 = scalar_lea.vmem %s2015_s9, 512  ;;  %p2017_p10 = scmp.lt.s32.totalorder %s2310_s20, %s2015_s9 }
  0x51   : > { %v1099_v43 = vld [vmem:[#allocation6 + $0xa0] sm:$0xff]  ;;  %v1187_v44 = vld [vmem:[#allocation6 + $0xb0] sm:$0xff]  ;;  %v1276_v45 = vld [vmem:[#allocation6 + $0xc8] sm:$0xff]  ;;  %p2013_p9 = pneg %p2012_p7  ;;  %p2018_p12 = scmp.lt.s32.totalorder %s2016_s7, %s2010_s4 }
  0x52   : > { %v225_v9 = vld [vmem:[#allocation2 + $0x1] sm:$0xff]  ;;  %v2248_v12 = vld [vmem:[#allocation2 + $0x9] sm:$0xff]  ;;  %v1009_v41 = vld [vmem:[#allocation2 + $0x11] sm:$0xff] }
  0x53   : > { %v221_v10 = vld [vmem:[#allocation2] sm:$0xff]  ;;  %1791 = vmatprep.mubr.msk.f32.mxu0 %vm218_vm1, %v225_v9  ;;  %v2250_v13 = vld [vmem:[#allocation2 + $0x8] sm:$0xff]  ;;  %v921_v40 = vld [vmem:[#allocation2 + $0x10] sm:$0xff]  ;;  %p2019_p13 = por %p2018_p12, %p2017_p10 }
  0x54   : > { %1798 = vmatprep.mubr.msk.f32.mxu1 %vm218_vm1, %v221_v10  ;;  %1792 = vmatmul.mubr.msk.f32.vlgmr.msra.gmra.mxu0 %vm218_vm1, %v2248_v12  ;;  %v392_v15 = vld [vmem:[#allocation2 + $0x2] sm:$0xff]  ;;  %v2256_v18 = vld [vmem:[#allocation2 + $0xa] sm:$0xff]  ;;  %v1097_v46 = vld [vmem:[#allocation2 + $0x12] sm:$0xff] }
  0x55   : > { %1799 = vmatmul.mubr.msk.f32.vlgmr.msra.gmra.mxu1 %vm218_vm1, %v2250_v13  ;;  %1802 = vmatpush3.msra.mxu0 %v396_v6  ;;  %v480_v16 = vld [vmem:[#allocation2 + $0x3] sm:$0xff]  ;;  %v2259_v19 = vld [vmem:[#allocation2 + $0xb] sm:$0xff]  ;;  %v1185_v47 = vld [vmem:[#allocation2 + $0x13] sm:$0xff]  ;;  %p2020_p0 = pnand %p2019_p13, %p2013_p9 }
  0x56   : > { %1809 = vmatpush3.msra.mxu1 %v484_v8  ;;  %1803 = vmatprep.subr.mxu0 %v395_v11  ;;  %v568_v23 = vld [vmem:[#allocation2 + $0x4] sm:$0xff]  ;;  %v2266_v26 = vld [vmem:[#allocation2 + $0xc] sm:$0xff]  ;;  %v1364_v48 = vld [vmem:[#allocation6 + $0xd8] sm:$0xff] }
  0x57   : > { %1810 = vmatprep.subr.mxu1 %v483_v14  ;;  %1804 = vmatpush3.msra.mxu0 %v395_v11  ;;  %v656_v24 = vld [vmem:[#allocation2 + $0x5] sm:$0xff]  ;;  %v2269_v27 = vld [vmem:[#allocation2 + $0xd] sm:$0xff]  ;;  %v1361_v53 = vld [vmem:[#allocation2 + $0x15] sm:$0xff] }
  0x58   : > { %1805 = vmatprep.mubr.msk.f32.mxu0 %vm218_vm1, %v392_v15  ;;  %1811 = vmatpush3.msra.mxu1 %v483_v14  ;;  %v744_v31 = vld [vmem:[#allocation2 + $0x6] sm:$0xff]  ;;  %v2276_v34 = vld [vmem:[#allocation2 + $0xe] sm:$0xff]  ;;  %v1449_v55 = vld [vmem:[#allocation2 + $0x16] sm:$0xff] }
  0x59   : > { %1812 = vmatprep.mubr.msk.f32.mxu1 %vm218_vm1, %v480_v16  ;;  %1815 = vmatprep.subr.mxu0 %v572_v17  ;;  %v832_v32 = vld [vmem:[#allocation2 + $0x7] sm:$0xff]  ;;  %v833_v35 = vld [vmem:[#allocation2 + $0xf] sm:$0xff] }
  0x5a   : > { %1806 = vmatmul.mubr.msk.f32.vlgmr.msra.gmra.mxu0 %vm218_vm1, %v2256_v18  ;;  %1813 = vmatmul.mubr.msk.f32.vlgmr.msra.gmra.mxu1 %vm218_vm1, %v2259_v19  ;;  %v1275_v49 = vld [vmem:[#allocation6 + $0xc0] sm:$0xff]  ;;  %v1363_v50 = vld [vmem:[#allocation6 + $0xd0] sm:$0xff]  ;;  %v1452_v51 = vld [vmem:[#allocation6 + $0xe8] sm:$0xff] }
  0x5b   : > { %1816 = vmatpush3.msra.mxu0 %v572_v17  ;;  %1822 = vmatprep.subr.mxu1 %v660_v20  ;;  %v1273_v52 = vld [vmem:[#allocation2 + $0x14] sm:$0xff]  ;;  %v1451_v54 = vld [vmem:[#allocation6 + $0xe0] sm:$0xff] }
  0x5c   : > { %1817 = vmatprep.subr.mxu0 %v571_v21  ;;  %1823 = vmatpush3.msra.mxu1 %v660_v20 }
  0x5d   : > { %1818 = vmatpush3.msra.mxu0 %v571_v21  ;;  %1824 = vmatprep.subr.mxu1 %v659_v22 }
  0x5e   : > { %1819 = vmatprep.mubr.msk.f32.mxu0 %vm218_vm1, %v568_v23  ;;  %1825 = vmatpush3.msra.mxu1 %v659_v22 }
  0x5f   : > { %1826 = vmatprep.mubr.msk.f32.mxu1 %vm218_vm1, %v656_v24  ;;  %1829 = vmatprep.subr.mxu0 %v748_v25 }
  0x60   : > { %1820 = vmatmul.mubr.msk.f32.vlgmr.msra.gmra.mxu0 %vm218_vm1, %v2266_v26  ;;  %1827 = vmatmul.mubr.msk.f32.vlgmr.msra.gmra.mxu1 %vm218_vm1, %v2269_v27 }
  0x61   : > { %1830 = vmatpush3.msra.mxu0 %v748_v25  ;;  %1836 = vmatprep.subr.mxu1 %v836_v28 }
  0x62   : > { %1831 = vmatprep.subr.mxu0 %v747_v29  ;;  %1837 = vmatpush3.msra.mxu1 %v836_v28 }
  0x63   : > { %1832 = vmatpush3.msra.mxu0 %v747_v29  ;;  %1838 = vmatprep.subr.mxu1 %v835_v30 }
  0x64   : > { %1833 = vmatprep.mubr.msk.f32.mxu0 %vm218_vm1, %v744_v31  ;;  %1839 = vmatpush3.msra.mxu1 %v835_v30 }
  0x65   : > { %1840 = vmatprep.mubr.msk.f32.mxu1 %vm218_vm1, %v832_v32  ;;  %1843 = vmatprep.subr.mxu0 %v924_v33 }
  0x66   : > { %1834 = vmatmul.mubr.msk.f32.vlgmr.msra.gmra.mxu0 %vm218_vm1, %v2276_v34  ;;  %1841 = vmatmul.mubr.msk.f32.vlgmr.msra.gmra.mxu1 %vm218_vm1, %v833_v35 }
  0x67   : > { %1844 = vmatpush3.msra.mxu0 %v924_v33  ;;  %1850 = vmatprep.subr.mxu1 %v1012_v36 }
  0x68   : > { %1845 = vmatprep.subr.mxu0 %v923_v37  ;;  %1851 = vmatpush3.msra.mxu1 %v1012_v36 }
  0x69   : > { %1846 = vmatpush3.msra.mxu0 %v923_v37  ;;  %1852 = vmatprep.subr.mxu1 %v1011_v38 }
  0x6a   : > { %1847 = vmatprep.mubr.msk.f32.mxu0 %vm218_vm1, %v2250_v13  ;;  %1853 = vmatpush3.msra.mxu1 %v1011_v38 }
  0x6b   : > { %1854 = vmatprep.mubr.msk.f32.mxu1 %vm218_vm1, %v2248_v12  ;;  %1857 = vmatprep.subr.mxu0 %v1100_v39 }
  0x6c   : > { %1848 = vmatmul.mubr.msk.f32.vlgmr.msra.gmra.mxu0 %vm218_vm1, %v921_v40  ;;  %1855 = vmatmul.mubr.msk.f32.vlgmr.msra.gmra.mxu1 %vm218_vm1, %v1009_v41 }
  0x6d   : > { %1858 = vmatpush3.msra.mxu0 %v1100_v39  ;;  %1864 = vmatprep.subr.mxu1 %v1188_v42 }
  0x6e   : > { %1859 = vmatprep.subr.mxu0 %v1099_v43  ;;  %1865 = vmatpush3.msra.mxu1 %v1188_v42 }
  0x6f   : > { %1860 = vmatpush3.msra.mxu0 %v1099_v43  ;;  %1866 = vmatprep.subr.mxu1 %v1187_v44 }
  0x70   : > { %1861 = vmatprep.mubr.msk.f32.mxu0 %vm218_vm1, %v2256_v18  ;;  %1867 = vmatpush3.msra.mxu1 %v1187_v44 }
  0x71   : > { %1868 = vmatprep.mubr.msk.f32.mxu1 %vm218_vm1, %v2259_v19  ;;  %1871 = vmatprep.subr.mxu0 %v1276_v45 }
  0x72   : > { %1862 = vmatmul.mubr.msk.f32.vlgmr.msra.gmra.mxu0 %vm218_vm1, %v1097_v46  ;;  %1869 = vmatmul.mubr.msk.f32.vlgmr.msra.gmra.mxu1 %vm218_vm1, %v1185_v47 }
  0x73   : > { %1872 = vmatpush3.msra.mxu0 %v1276_v45  ;;  %1878 = vmatprep.subr.mxu1 %v1364_v48 }
  0x74   : > { %1873 = vmatprep.subr.mxu0 %v1275_v49  ;;  %1879 = vmatpush3.msra.mxu1 %v1364_v48 }
  0x75   : > { %1874 = vmatpush3.msra.mxu0 %v1275_v49  ;;  %1880 = vmatprep.subr.mxu1 %v1363_v50 }
  0x76   : > { %1875 = vmatprep.mubr.msk.f32.mxu0 %vm218_vm1, %v2266_v26  ;;  %1881 = vmatpush3.msra.mxu1 %v1363_v50 }
  0x77   : > { %1882 = vmatprep.mubr.msk.f32.mxu1 %vm218_vm1, %v2269_v27  ;;  %1885 = vmatprep.subr.mxu0 %v1452_v51 }
  0x78   : > { %1876 = vmatmul.mubr.msk.f32.vlgmr.msra.gmra.mxu0 %vm218_vm1, %v1273_v52  ;;  %1883 = vmatmul.mubr.msk.f32.vlgmr.msra.gmra.mxu1 %vm218_vm1, %v1361_v53 }
  0x79   : > { %1886 = vmatpush3.msra.mxu0 %v1452_v51  ;;  %1889 = vmatprep.mubr.msk.f32.mxu0 %vm218_vm1, %v2276_v34 }
  0x7a   : > { %1887 = vmatprep.subr.mxu0 %v1451_v54 }
  0x7b   : > { %1888 = vmatpush3.msra.mxu0 %v1451_v54 }
  0x7c   : > { %1890 = vmatmul.mubr.msk.f32.vlgmr.msra.gmra.mxu0 %vm218_vm1, %v1449_v55 }
 0x114   : > { %v1793_v56 = vpop.f32.mrf.mxu0 }
 0x115   : > { %v1800_v57 = vpop.f32.mrf.mxu1 }
 0x116   : > { %v302_v58 = vpop.f32.mrf.mxu0  ;;  %v389_v60 = vadd.f32 %v1800_v57, %v1793_v56 }
 0x117   : > { %v383_v59 = vpop.f32.mrf.mxu1 }
 0x118   : > { %v384_v62 = vadd.f32 %v383_v59, %v302_v58 }
 0x11a   : > { %v1807_v61 = vpop.f32.mrf.mxu0  ;;  %v1814_v0 = vpop.f32.mrf.mxu1 }
 0x11b   : > { %v479_v63 = vadd.f32 %v1807_v61, %v389_v60 }
 0x11c   : > { %v469_v1 = vpop.f32.mrf.mxu0  ;;  %v557_v4 = vpop.f32.mrf.mxu1 }
 0x11d   : > { %v567_v2 = vadd.f32 %v1814_v0, %v479_v63  ;;  %v478_v3 = vadd.f32 %v469_v1, %v384_v62 }
 0x11f   : > { %v566_v5 = vadd.f32 %v557_v4, %v478_v3 }
 0x120   : > { %v1821_v6 = vpop.f32.mrf.mxu0  ;;  %v1828_v8 = vpop.f32.mrf.mxu1 }
 0x121   : > { %v655_v7 = vadd.f32 %v1821_v6, %v567_v2 }
 0x122   : > { %v645_v9 = vpop.f32.mrf.mxu0  ;;  %v733_v12 = vpop.f32.mrf.mxu1 }
 0x123   : > { %v743_v10 = vadd.f32 %v1828_v8, %v655_v7  ;;  %v654_v11 = vadd.f32 %v645_v9, %v566_v5 }
 0x125   : > { %v742_v13 = vadd.f32 %v733_v12, %v654_v11 }
 0x126   : > { %v1835_v14 = vpop.f32.mrf.mxu0  ;;  %v1842_v16 = vpop.f32.mrf.mxu1 }
 0x127   : > { %v831_v15 = vadd.f32 %v1835_v14, %v743_v10 }
 0x128   : > { %v821_v17 = vpop.f32.mrf.mxu0  ;;  %v909_v20 = vpop.f32.mrf.mxu1 }
 0x129   : > { %v919_v18 = vadd.f32 %v1842_v16, %v831_v15  ;;  %v830_v19 = vadd.f32 %v821_v17, %v742_v13 }
 0x12b   : > { %v918_v21 = vadd.f32 %v909_v20, %v830_v19 }
 0x12c   : > { %v1849_v22 = vpop.f32.mrf.mxu0  ;;  %v1856_v24 = vpop.f32.mrf.mxu1 }
 0x12d   : > { %v1007_v23 = vadd.f32 %v1849_v22, %v919_v18 }
 0x12e   : > { %v997_v25 = vpop.f32.mrf.mxu0  ;;  %v1085_v28 = vpop.f32.mrf.mxu1 }
 0x12f   : > { %v1095_v26 = vadd.f32 %v1856_v24, %v1007_v23  ;;  %v1006_v27 = vadd.f32 %v997_v25, %v918_v21 }
 0x131   : > { %v1094_v29 = vadd.f32 %v1085_v28, %v1006_v27 }
 0x132   : > { %v1863_v30 = vpop.f32.mrf.mxu0  ;;  %v1870_v32 = vpop.f32.mrf.mxu1 }
 0x133   : > { %v1183_v31 = vadd.f32 %v1863_v30, %v1095_v26 }
 0x134   : > { %v1173_v33 = vpop.f32.mrf.mxu0  ;;  %v1261_v36 = vpop.f32.mrf.mxu1 }
 0x135   : > { %v1271_v34 = vadd.f32 %v1870_v32, %v1183_v31  ;;  %v1182_v35 = vadd.f32 %v1173_v33, %v1094_v29 }
 0x137   : > { %v1270_v37 = vadd.f32 %v1261_v36, %v1182_v35 }
 0x138   : > { %v1877_v38 = vpop.f32.mrf.mxu0  ;;  %v1884_v40 = vpop.f32.mrf.mxu1 }
 0x139   : > { %v1359_v39 = vadd.f32 %v1877_v38, %v1271_v34 }
 0x13a   : > { %v1349_v41 = vpop.f32.mrf.mxu0  ;;  %v1437_v44 = vpop.f32.mrf.mxu1 }
 0x13b   : > { %v1447_v42 = vadd.f32 %v1884_v40, %v1359_v39  ;;  %v1358_v43 = vadd.f32 %v1349_v41, %v1270_v37 }
 0x13c   : > { %v1891_v45 = vpop.f32.mrf.mxu0 }
 0x13d   : > { %v1446_v46 = vadd.f32 %v1437_v44, %v1358_v43  ;;  %v1535_v47 = vadd.f32 %v1891_v45, %v1447_v42 }
 0x13e   : > { %v1525_v48 = vpop.f32.mrf.mxu0 }
 0x13f   : > { %1537 = vst.msk [vmem:[%s204_s18 + $0x8] sm:$0xff] %vm218_vm1, %v1535_v47  ;;  %v1534_v49 = vadd.f32 %v1525_v48, %v1446_v46  ;;  %vm1539_vm2 = vcmp.ge.f32.partialorder %v1535_v47, 0.6 }
 0x140   : > { %v1541_v50 = vsel %vm1539_vm2, -inf, %v1535_v47 }
 0x141   : > { %1536 = vst.msk [vmem:[%s204_s18] sm:$0xff] %vm218_vm1, %v1534_v49  ;;  %vm1538_vm3 = vcmp.ge.f32.partialorder %v1534_v49, 0.6  ;;  %v1543_v53 = vsel %vm218_vm1, %v1541_v50, -inf }
 0x142   : > { %v1540_v51 = vsel %vm1538_vm3, -inf, %v1534_v49 }
 0x143   : > { %v1542_v52 = vsel %vm218_vm1, %v1540_v51, -inf }
 0x144   : > { %v1544_v54 = vmax.f32 %v1542_v52, %v1543_v53 }
 0x146   : > { %1545 = vmax.xlane.f32.xlu0 %v1544_v54 }
 0x147   : > { %2023 = shalt.err (!%p2020_p0)
}
 0x148   : > { %s2024_s10 = scalar_lea.hbm %s2316_s22, 256  ;;  %s2028_s27 = scalar_lea.hbm %s2366_s2, 512 }
 0x149   : > { %p2025_p5 = scmp.ne.s32.totalorder %s2316_s22, %s2024_s10  ;;  %p2029_p4 = scmp.lt.s32.totalorder %s2316_s22, %s2366_s2 }
 0x14a   : > { %p2030_p6 = scmp.lt.s32.totalorder %s2028_s27, %s2024_s10 }
 0x14b   : > { %p2026_p2 = pnand %p2025_p5, %p2383_p11 }
 0x14c   : > { %p2031_p8 = por %p2030_p6, %p2029_p4 }
 0x14d   : > { %p2027_p1 = pneg %p2026_p2 }
 0x14f   : > { %p2032_p3 = pnand %p2031_p8, %p2027_p1 }
 0x151   : > { %2035 = shalt.err (!%p2032_p3)
}
 0x152   : > { %s2086_s18 = smov 128   ;;  %s2087_s28 = smov 8   ;;  %vm1555_vm4 = vcmask 0  }
 0x153   : > { %1900 = dma.vmem_to_hbm [thread:$0]  (%p2383_p11), %s2310_s20, 256, %s2316_s22, %s1558_s25, %s2086_s18, %s2086_s18, %s2087_s28  }
 0x154   : > { %p210_p7 = scmp.lt.s32.totalorder %s2129_s16, 1 }
 0x156   : > { %s2391_s16 = smov (!%p210_p7, %s2129_s16), 1 }
 0x157   : > { %s212_s4 = scalar_lea.vmem %s2367_s3, %s2391_s16 }
 0x1cf   : > { %v1546_v55 = vpop.xlane.xlu0 %1545 }
 0x1d0   : > { %v1547_v56 = vrot.slane %v1546_v55, 4 }
 0x1d2   : > { %v1548_v57 = vmax.f32 %v1546_v55, %v1547_v56 }
 0x1d4   : > { %v1549_v58 = vrot.slane %v1548_v57, 2 }
 0x1d6   : > { %v1550_v59 = vmax.f32 %v1548_v57, %v1549_v58 }
 0x1d8   : > { %v1551_v60 = vrot.slane %v1550_v59, 1 }
 0x1da   : > { %v1552_v61 = vmax.f32 %v1550_v59, %v1551_v60 }
 0x1dc   : > { %1892 = vpush %v1552_v61 }
 0x20d   : > { %s1893_s8 = spop %1892 }
 0x20e   : > { %v1554_v62 = vstv %s1893_s8 }
 0x20f   : > { %1556 = vst.msk [vmem:[%s212_s4] sm:$0x1] %vm1555_vm4, %v1554_v62 }
 0x210 PF: > { %s1592_s6 = sand.u32 1, %s2066_s12   ;;  %p2384_p11 = scmp.ne.s32.totalorder %s2373_s19, 0 }
 0x211   : > { %p2385_p9 = scmp.ge.s32.totalorder %s2078_s15, 2  ;;  %s1593_s26 = scalar_lea.sflag [#allocation5], %s1592_s6 }
 0x213   : > { %p1911_p10 = pnand %p2385_p9, %p2384_p11 }
 0x215   : > { %p1912_p12 = pneg %p1911_p10 }
 0x217   : > { %2061 = dma.done.wait (%p1912_p12), %s1593_s26, 256  }
 0x218   : > { %2063 = vsyncadd (%p1912_p12), %s1593_s26, 4294967040  ;;  %p18_p13 = scmp.ge.s32.totalorder %s2162_s24, 4   ;;  %s2386_s12 = smov %s2070_s13 }
 0x219   : > { %s2387_s13 = smov %s2074_s14  ;;  %s2388_s14 = smov %s2182_s5 }
 0x21a   : > { %s2389_s15 = smov %s2162_s24  ;;  %20 = sbr.rel (!%p18_p13) target bundleno = 6 (0x6), region = 103 }
 0x21f   :  { %1604 = vsyncpa [#allocation4], 1 }
 0x220   :  { %1606 = vsyncpa [#allocation4 + $0x1], 1 }
 0x221   :  { %1607 = vsyncpa [#allocation7], 1 }
 0x222   :  { %1608 = vsyncpa [#allocation5], 1 }
 0x223   :  { %1610 = vsyncpa [#allocation5 + $0x1], 1 }

</bundles_post_ra>
